<compile_context>
chip_gen: v5e
topology: v5e:2x2
jax: 0.10.0
libtpu: 0.0.40
codegen_flags: <defaults>
</compile_context>

<pallas_src>
import jax
import jax.numpy as jnp
from jax.experimental import pallas as pl
from jax.experimental.pallas import tpu as pltpu

_LANE = 128


def _round_up(x: int, m: int) -> int:
    return (x + m - 1) // m * m


def residual_block_kernel(x_ref, w1_ref, b1_ref, w2_ref, b2_ref, o_ref):
    x = x_ref[...]                                        # (tb, Dp) f32
    # fc1 + ReLU (dropout == identity in eval mode); bf16 in -> f32 accumulate.
    h = jnp.dot(x.astype(jnp.bfloat16), w1_ref[...],
                preferred_element_type=jnp.float32)
    h = jnp.maximum(h + b1_ref[...], 0.0)                 # f32 elementwise
    # fc2 (bf16 in -> f32 accumulate)
    o2 = jnp.dot(h.astype(jnp.bfloat16), w2_ref[...],
                 preferred_element_type=jnp.float32)
    # bias + residual in f32
    o_ref[...] = (x + o2 + b2_ref[...]).astype(o_ref.dtype)


def residual_block(x, w1, b1, w2, b2, *, tb=None):
    """x:(B,D_in)  w1:(D_in,H)  b1:(H,)|(1,H)  w2:(H,D_out)  b2:(D_out,)|(1,D_out).
    Requires D_in == D_out (residual add)."""
    B, D_in = x.shape
    H = w1.shape[1]
    D_out = w2.shape[1]
    assert D_in == D_out, "residual add requires input_size == output_size"

    # --- pad feature dims to multiples of 128 (lane-dense loads/stores, MXU fill)
    Dp = _round_up(D_in, _LANE)
    Hp = _round_up(H, _LANE)

    x_p = jnp.pad(x.astype(jnp.float32), ((0, 0), (0, Dp - D_in)))
    w1_p = jnp.pad(w1, ((0, Dp - D_in), (0, Hp - H))).astype(jnp.bfloat16)
    w2_p = jnp.pad(w2, ((0, Hp - H), (0, Dp - D_out))).astype(jnp.bfloat16)
    b1_p = jnp.pad(jnp.reshape(b1, (1, H)).astype(jnp.float32),
                   ((0, 0), (0, Hp - H)))
    b2_p = jnp.pad(jnp.reshape(b2, (1, D_out)).astype(jnp.float32),
                   ((0, 0), (0, Dp - D_out)))

    # --- batch tile: largest of 512/256/128 that still yields >= 2 grid steps
    #     (pipelining + v7x megacore); tiny batches fall back to one full tile.
    if tb is None:
        if B >= 1024:
            tb = 512
        elif B >= 512:
            tb = 256
        elif B >= 256:
            tb = 128
        else:
            tb = B
    grid = (pl.cdiv(B, tb),)

    out_p = pl.pallas_call(
        residual_block_kernel,
        out_shape=jax.ShapeDtypeStruct((B, Dp), x.dtype),
        grid_spec=pltpu.PrefetchScalarGridSpec(
            num_scalar_prefetch=0,
            grid=grid,
            in_specs=[
                pl.BlockSpec((tb, Dp), lambda i: (i, 0)),   # x tile (pipelined)
                pl.BlockSpec((Dp, Hp), lambda i: (0, 0)),   # W1 (grid-invariant)
                pl.BlockSpec((1, Hp), lambda i: (0, 0)),    # b1
                pl.BlockSpec((Hp, Dp), lambda i: (0, 0)),   # W2 (grid-invariant)
                pl.BlockSpec((1, Dp), lambda i: (0, 0)),    # b2
            ],
            out_specs=pl.BlockSpec((tb, Dp), lambda i: (i, 0)),
        ),
        compiler_params=pltpu.CompilerParams(
            dimension_semantics=("parallel",),   # shard batch across TCs on v7x
        ),
    )(x_p, w1_p, b1_p, w2_p, b2_p)

    # Slice padded feature columns back off.
    return out_p[:, :D_out]


if __name__ == "__main__":
    # paras = (input_size, hidden_size, output_size, dropout)
    input_size, hidden_size, output_size, dropout = 32, 64, 32, 0.1
    batch = 256   # -> tb=128, grid=(2,): real pipelining + both v7x cores busy

    key = jax.random.PRNGKey(0)
    kx, kw1, kb1, kw2, kb2 = jax.random.split(key, 5)
    x = jax.random.normal(kx, (batch, input_size), dtype=jnp.float32)

    # Deterministic param init (PyTorch-Linear-like uniform bounds).
    bound1 = 1.0 / (input_size ** 0.5)
    bound2 = 1.0 / (hidden_size ** 0.5)
    w1 = jax.random.uniform(kw1, (input_size, hidden_size),
                            minval=-bound1, maxval=bound1, dtype=jnp.float32)
    b1 = jax.random.uniform(kb1, (hidden_size,),
                            minval=-bound1, maxval=bound1, dtype=jnp.float32)
    w2 = jax.random.uniform(kw2, (hidden_size, output_size),
                            minval=-bound2, maxval=bound2, dtype=jnp.float32)
    b2 = jax.random.uniform(kb2, (output_size,),
                            minval=-bound2, maxval=bound2, dtype=jnp.float32)

    out = residual_block(x, w1, b1, w2, b2)
    out = jax.block_until_ready(out)
    assert out.shape == (batch, output_size)

    # Reference with the same bf16-input / f32-accumulate matmul semantics.
    w1_bf = w1.astype(jnp.bfloat16)
    w2_bf = w2.astype(jnp.bfloat16)
    h_ref = jnp.maximum(
        jnp.dot(x.astype(jnp.bfloat16), w1_bf,
                preferred_element_type=jnp.float32) + b1, 0.0)
    ref = x + jnp.dot(h_ref.astype(jnp.bfloat16), w2_bf,
                      preferred_element_type=jnp.float32) + b2
    assert jnp.allclose(out, ref, atol=1e-3, rtol=1e-3), "mismatch vs bf16/f32 reference"

    # Loose sanity check against the pure-f32 math of the PyTorch module.
    ref_f32 = x + (jnp.maximum(x @ w1 + b1, 0.0) @ w2 + b2)
    assert jnp.allclose(out, ref_f32, atol=5e-2, rtol=5e-2), "mismatch vs f32 reference"

    print("KERNEL_OK")
</pallas_src>

<mosaic_0001>
module attributes {stable_mosaic.version = 11 : i64} {
  func.func @residual_block_kernel(%arg0: i32, %arg1: memref<128x128xf32, #tpu.memory_space<vmem>>, %arg2: memref<128x128xbf16, #tpu.memory_space<vmem>>, %arg3: memref<1x128xf32, #tpu.memory_space<vmem>>, %arg4: memref<128x128xbf16, #tpu.memory_space<vmem>>, %arg5: memref<1x128xf32, #tpu.memory_space<vmem>>, %arg6: memref<128x128xf32, #tpu.memory_space<vmem>>) attributes {dimension_semantics = [#tpu.dimension_semantics<parallel>], iteration_bounds = array<i64: 2>, scalar_prefetch = 0 : i64, scratch_operands = 0 : i64, tpu.core_type = #tpu.core_type<tc>, window_params = [{transform_indices = @transform_0, window_bounds = array<i64: 128, 128>}, {pipeline_mode = #tpu.pipeline_mode<synchronous>, transform_indices = @transform_1, window_bounds = array<i64: 128, 128>}, {pipeline_mode = #tpu.pipeline_mode<synchronous>, transform_indices = @transform_2, window_bounds = array<i64: 1, 128>}, {pipeline_mode = #tpu.pipeline_mode<synchronous>, transform_indices = @transform_3, window_bounds = array<i64: 128, 128>}, {pipeline_mode = #tpu.pipeline_mode<synchronous>, transform_indices = @transform_4, window_bounds = array<i64: 1, 128>}, {transform_indices = @transform_5, window_bounds = array<i64: 128, 128>}]} {
    %c0 = arith.constant 0 : index
    %c0_0 = arith.constant 0 : index
    %0 = vector.load %arg1[%c0, %c0_0] : memref<128x128xf32, #tpu.memory_space<vmem>>, vector<128x128xf32>
    %1 = arith.truncf %0 : vector<128x128xf32> to vector<128x128xbf16>
    %c0_1 = arith.constant 0 : index
    %c0_2 = arith.constant 0 : index
    %2 = vector.load %arg2[%c0_1, %c0_2] : memref<128x128xbf16, #tpu.memory_space<vmem>>, vector<128x128xbf16>
    %cst = arith.constant dense<0.000000e+00> : vector<128x128xf32>
    %3 = tpu.matmul %1, %2, %cst {dimension_numbers = #tpu.dot_dimension_numbers<[1], [0], [0], [1], [0, 0, 1, 1], [], []>} : vector<128x128xbf16>, vector<128x128xbf16>, vector<128x128xf32> -> vector<128x128xf32>
    %c0_3 = arith.constant 0 : index
    %c0_4 = arith.constant 0 : index
    %4 = vector.load %arg3[%c0_3, %c0_4] : memref<1x128xf32, #tpu.memory_space<vmem>>, vector<1x128xf32>
    %5 = vector.broadcast %4 : vector<1x128xf32> to vector<128x128xf32>
    %6 = arith.addf %3, %5 : vector<128x128xf32>
    %cst_5 = arith.constant 0.000000e+00 : f32
    %7 = vector.broadcast %cst_5 : f32 to vector<128x128xf32>
    %8 = arith.maximumf %6, %7 : vector<128x128xf32>
    %9 = arith.truncf %8 : vector<128x128xf32> to vector<128x128xbf16>
    %c0_6 = arith.constant 0 : index
    %c0_7 = arith.constant 0 : index
    %10 = vector.load %arg4[%c0_6, %c0_7] : memref<128x128xbf16, #tpu.memory_space<vmem>>, vector<128x128xbf16>
    %cst_8 = arith.constant dense<0.000000e+00> : vector<128x128xf32>
    %11 = tpu.matmul %9, %10, %cst_8 {dimension_numbers = #tpu.dot_dimension_numbers<[1], [0], [0], [1], [0, 0, 1, 1], [], []>} : vector<128x128xbf16>, vector<128x128xbf16>, vector<128x128xf32> -> vector<128x128xf32>
    %12 = arith.addf %0, %11 : vector<128x128xf32>
    %c0_9 = arith.constant 0 : index
    %c0_10 = arith.constant 0 : index
    %13 = vector.load %arg5[%c0_9, %c0_10] : memref<1x128xf32, #tpu.memory_space<vmem>>, vector<1x128xf32>
    %14 = vector.broadcast %13 : vector<1x128xf32> to vector<128x128xf32>
    %15 = arith.addf %12, %14 : vector<128x128xf32>
    %c0_11 = arith.constant 0 : index
    %c0_12 = arith.constant 0 : index
    %16 = vector.load %arg6[%c0_11, %c0_12] : memref<128x128xf32, #tpu.memory_space<vmem>>, vector<128x128xf32>
    tpu.vector_store %arg6[%c0_11, %c0_12], %15 {strides = array<i32>} : memref<128x128xf32, #tpu.memory_space<vmem>>, vector<128x128xf32>,
    return
  }
  func.func @transform_0(%arg0: i32) -> (i32, i32) {
    %c0_i32 = arith.constant 0 : i32
    %c0_i32_0 = arith.constant 0 : i32
    return %arg0, %c0_i32 : i32, i32
  }
  func.func @transform_1(%arg0: i32) -> (i32, i32) {
    %c0_i32 = arith.constant 0 : i32
    %c0_i32_0 = arith.constant 0 : i32
    %c0_i32_1 = arith.constant 0 : i32
    return %c0_i32, %c0_i32_0 : i32, i32
  }
  func.func @transform_2(%arg0: i32) -> (i32, i32) {
    %c0_i32 = arith.constant 0 : i32
    %c0_i32_0 = arith.constant 0 : i32
    %c0_i32_1 = arith.constant 0 : i32
    return %c0_i32, %c0_i32_0 : i32, i32
  }
  func.func @transform_3(%arg0: i32) -> (i32, i32) {
    %c0_i32 = arith.constant 0 : i32
    %c0_i32_0 = arith.constant 0 : i32
    %c0_i32_1 = arith.constant 0 : i32
    return %c0_i32, %c0_i32_0 : i32, i32
  }
  func.func @transform_4(%arg0: i32) -> (i32, i32) {
    %c0_i32 = arith.constant 0 : i32
    %c0_i32_0 = arith.constant 0 : i32
    %c0_i32_1 = arith.constant 0 : i32
    return %c0_i32, %c0_i32_0 : i32, i32
  }
  func.func @transform_5(%arg0: i32) -> (i32, i32) {
    %c0_i32 = arith.constant 0 : i32
    %c0_i32_0 = arith.constant 0 : i32
    return %arg0, %c0_i32 : i32, i32
  }
}

</mosaic_0001>

<bundles_post_ra>
// kernel: tpu_custom_call.1
= control target key start
LH: loop header
LB: loop body
LE: loop exit
PB: predicated region body
PF: predicated region fallthrough
CT: control target
= control target key end

     0   :  { %10 = vsyncpa [#allocation3], 0  ;;  %s1379_s0 = inlined_call_operand.hbm [shape: f32[256,128], index: 0, kind: input, shape index: {}]   ;;  %s1380_s1 = inlined_call_operand.hbm [shape: bf16[128,128], index: 1, kind: input, shape index: {}]   ;;  %s1381_s2 = inlined_call_operand.vmem [shape: f32[1,128], index: 2, kind: input, shape index: {}]   ;;  %s1382_s3 = inlined_call_operand.hbm [shape: bf16[128,128], index: 3, kind: input, shape index: {}]   ;;  %s1383_s4 = inlined_call_operand.vmem [shape: f32[1,128], index: 4, kind: input, shape index: {}]   ;;  %s1384_s5 = inlined_call_operand.hbm [shape: f32[256,128], index: 5, kind: output, shape index: {}]  }
   0x1   :  { %12 = vsyncpa [#allocation3 + $0x1], 0 }
   0x2   :  { %13 = vsyncpa [#allocation6], 0 }
   0x3   :  { %14 = vsyncpa [#allocation4], 0 }
   0x4   :  { %16 = vsyncpa [#allocation4 + $0x1], 0  ;;  %s1109_s18 = smov 0   ;;  %s1111_s19 = smov 0  }
   0x5   :  { %s1113_s20 = smov 0   ;;  %s1115_s21 = smov 0  }
   0x6 LB: > { %s1130_s22 = sadd.s32 4294967295, %s1069_s21   ;;  %s718_s23 = sadd.s32 4294967294, %s1069_s21   ;;  %s1069_s21 = sphi %s1115_s21, %s1394_s21   ;;  %s1065_s20 = sphi %s1113_s20, %s1393_s20   ;;  %s1061_s19 = sphi %s1111_s19, %s1392_s19   ;;  %s1057_s18 = sphi %s1109_s18, %s1391_s18  }
   0x7   : > { %p42_p0 = scmp.ne.s32.totalorder %s1061_s19, %s1057_s18  ;;  %p43_p1 = scmp.eq.s32.totalorder %s1130_s22, 0 }
   0x8   : > { %p150_p2 = scmp.eq.s32.totalorder %s1130_s22, 1  ;;  %p156_p3 = scmp.eq.s32.totalorder %s718_s23, 1 }
   0x9   : > { %p1139_p4 = por %p43_p1, %p42_p0  ;;  %p719_p5 = scmp.ge.s32.totalorder %s1069_s21, 1 }
   0xa   : > { %p1144_p6 = por %p156_p3, %p42_p0  ;;  %p163_p7 = scmp.lt.s32.totalorder %s1069_s21, 3 }
   0xb   : > { %s174_s28 = sshll.u32 %s1380_s1, 4  ;;  %s1071_s30 = smov [#allocation5]   ;;  %s175_s28 = int_to_ptr.hbm [resolvable:$true] %s174_s28 }
   0xc   : > { %p1152_p8 = pnand %p719_p5, %p163_p7  ;;  %s176_s6 = sshll.u32 %s1071_s30, 4  ;;  %s177_s6 = int_to_ptr.vmem [resolvable:$true] %s176_s6 }
   0xd   : > { %s191_s9 = sshll.u32 %s1382_s3, 4  ;;  %s1072_s10 = smov 64   ;;  %s192_s9 = int_to_ptr.hbm [resolvable:$true] %s191_s9 }
   0xe   : > { %p846_p9 = pneg %p1152_p8  ;;  %s1073_s11 = smov 4  }
   0xf   : > { %s1074_s12 = smov [#allocation7]   ;;  %s1165_s14 = sadd.s32 1, %s1069_s21  }
  0x10   : > { %p847_p10 = pnand %p846_p9, %p43_p1  ;;  %s193_s13 = sshll.u32 %s1074_s12, 4  ;;  %s194_s13 = int_to_ptr.vmem [resolvable:$true] %s193_s13 }
  0x11   : > { %s29_s15 = sadd.s32 1, %s1065_s20  ;;  %s26_s16 = ssub.s32 %s1069_s21, %s1165_s14 }
  0x12   : > { %849 = dma.hbm_to_vmem [thread:$0]  (!%p847_p10), %s175_s28, 1024, %s177_s6, [#allocation6], %s1072_s10, %s1072_s10, %s1073_s11  }
  0x13   : > { %852 = dma.hbm_to_vmem [thread:$0]  (!%p847_p10), %s192_s9, 1024, %s194_s13, [#allocation6], %s1072_s10, %s1072_s10, %s1073_s11  }
  0x14   : > { %p36_p12 = scmp.ne.s32.totalorder %s1065_s20, %s1061_s19  ;;  %p27_p13 = scmp.eq.s32.totalorder %s26_s16, 0 }
  0x15   : > { %p37_p0 = scmp.eq.s32.totalorder %s1069_s21, 0  ;;  %p863_p5 = scmp.lt.s32.totalorder %s1069_s21, 2 }
  0x16   : > { %p1175_p3 = por %p150_p2, %p36_p12  ;;  %s210_s26 = sand.u32 1, %s1065_s20  }
  0x17   : > { %s1181_s23 = scalar_select %p27_p13, %s1065_s20, %s29_s15  }
  0x18   : > { %p38_p7 = por %p37_p0, %p36_p12  ;;  %s723_s27 = sshll.u32 %s210_s26, 7 }
  0x19   : > { %s800_s28 = sshll.u32 %s1069_s21, 7  ;;  %s214_s8 = scalar_lea.vmem [#allocation2], %s723_s27 }
  0x1a   : > { %s219_s7 = scalar_lea.hbm %s1379_s0, %s800_s28  ;;  %s222_s9 = sshll.u32 %s214_s8, 4  ;;  %s223_s9 = int_to_ptr.vmem [resolvable:$true] %s222_s9 }
  0x1b   : > { %s220_s10 = sshll.u32 %s219_s7, 4  ;;  %p1188_p2 = pnand %p863_p5, %p38_p7  ;;  %s221_s10 = int_to_ptr.hbm [resolvable:$true] %s220_s10 }
  0x1c   : > { %s211_s12 = scalar_lea.sflag [#allocation3], %s210_s26  ;;  %s969_s13 = sshra.s32 %s221_s10, 4  ;;  %s970_s13 = int_to_ptr.hbm [resolvable:$true] %s969_s13 }
  0x1d   : > { %s971_s15 = scalar_lea.hbm %s970_s13, 128  ;;  %p973_p10 = pneg %p1188_p2 }
  0x1e   : > { %p972_p9 = scmp.ne.s32.totalorder %s970_s13, %s971_s15  ;;  %s976_s28 = scalar_lea.hbm %s1379_s0, 256 }
  0x1f   : > { %p977_p0 = scmp.lt.s32.totalorder %s970_s13, %s1379_s0  ;;  %p978_p5 = scmp.lt.s32.totalorder %s976_s28, %s971_s15 }
  0x20   : > { %p974_p12 = pnand %p973_p10, %p972_p9 }
  0x21   : > { %p979_p7 = por %p978_p5, %p977_p0 }
  0x22   : > { %p975_p13 = pneg %p974_p12 }
  0x24   : > { %p980_p11 = pnand %p979_p7, %p975_p13 }
  0x26   : > { %983 = shalt.err (!%p980_p11)
}
  0x27   : > { %s1075_s26 = smov 128   ;;  %s1076_s7 = smov 8  }
  0x28   : > { %856 = dma.hbm_to_vmem [thread:$0]  (!%p1188_p2), %s221_s10, 2048, %s223_s9, %s211_s12, %s1075_s26, %s1075_s26, %s1076_s7  }
  0x29   : > { %234 = sbr.rel (%p1152_p8) target bundleno = 423 (0x1a7), region = 40  ;;  %s1205_s8 = sand.u32 (!%p1152_p8), 1, %s1061_s19  }
  0x2a   : > { %s727_s13 = sshll.u32 (!%p1152_p8), %s1205_s8, 7  ;;  %s237_s15 = scalar_lea.sflag (!%p1152_p8), [#allocation3], %s1205_s8 }
  0x2b   : > { %s1211_s16 = scalar_lea.vmem (!%p1152_p8), [#allocation2], %s727_s13 }
  0x2e   : > { %1044 = dma.done.wait (%p1139_p4), %s237_s15, 2048  }
  0x2f   : > { %1046 = vsyncadd (%p1139_p4), %s237_s15, 4294965248 }
  0x30   : > { %1048 = dma.done.wait (%p43_p1), [#allocation6], 2048  }
  0x31   : > { %1050 = vsyncadd (%p43_p1), [#allocation6], 4294965248  ;;  %v808_v0 = vld [vmem:[#allocation5 + $0x38] sm:$0xff]  ;;  %v807_v1 = vld [vmem:[#allocation5 + $0x30] sm:$0xff]  ;;  %s1297_s11 = scalar_lea.vmem [#allocation8], %s727_s13  ;;  %s817_s12 = sshll.u32 %s1130_s22, 7 }
  0x32   : > { %372 = vmatpush.bf16.msra.mxu0 %v808_v0  ;;  %818 = vmatpush.bf16.msra.mxu2 %v808_v0  ;;  %v806_v2 = vld [vmem:[#allocation5 + $0x28] sm:$0xff]  ;;  %v805_v3 = vld [vmem:[#allocation5 + $0x20] sm:$0xff]  ;;  %v804_v4 = vld [vmem:[#allocation5 + $0x18] sm:$0xff]  ;;  %s622_s30 = scalar_lea.hbm %s1384_s5, %s817_s12  ;;  %s623_s6 = sshll.u32 %s1297_s11, 4  ;;  %s624_s6 = int_to_ptr.vmem [resolvable:$true] %s623_s6 }
  0x33   : > { %v803_v5 = vld [vmem:[#allocation5 + $0x10] sm:$0xff]  ;;  %v802_v6 = vld [vmem:[#allocation5 + $0x8] sm:$0xff]  ;;  %v801_v7 = vld [vmem:[#allocation5] sm:$0xff]  ;;  %s625_s26 = sshll.u32 %s622_s30, 4  ;;  %s611_s7 = scalar_lea.sflag [#allocation4], %s1205_s8  ;;  %s626_s26 = int_to_ptr.hbm [resolvable:$true] %s625_s26 }
  0x34   : > { %v1222_v8 = vld [vmem:[%s1211_s16] sm:$0xff]  ;;  %v1225_v9 = vld [vmem:[%s1211_s16 + $0x8] sm:$0xff]  ;;  %v1238_v14 = vld [vmem:[%s1211_s16 + $0x10] sm:$0xff]  ;;  %s1013_s22 = sshra.s32 %s626_s26, 4  ;;  %s1019_s24 = scalar_lea.hbm %s1384_s5, 256  ;;  %s1014_s22 = int_to_ptr.hbm [resolvable:$true] %s1013_s22 }
  0x35   : > { %v1228_v10 = vld [vmem:[%s1211_s16 + $0x40] sm:$0xff]  ;;  %v1231_v11 = vld [vmem:[%s1211_s16 + $0x48] sm:$0xff]  ;;  %v296_v12 = vpack.c.bf16 %v1225_v9, %v1222_v8  ;;  %v1241_v15 = vld [vmem:[%s1211_s16 + $0x18] sm:$0xff]  ;;  %s1015_s13 = scalar_lea.hbm %s1014_s22, 128  ;;  %p1020_p11 = scmp.lt.s32.totalorder %s1014_s22, %s1384_s5 }
  0x36   : > { %373 = vmatpush.bf16.msra.mxu0 %v807_v1  ;;  %819 = vmatpush.bf16.msra.mxu2 %v807_v1  ;;  %v300_v13 = vpack.c.bf16 %v1231_v11, %v1228_v10  ;;  %v1244_v16 = vld [vmem:[%s1211_s16 + $0x50] sm:$0xff]  ;;  %v1247_v17 = vld [vmem:[%s1211_s16 + $0x58] sm:$0xff]  ;;  %v297_v18 = vpack.c.bf16 %v1241_v15, %v1238_v14  ;;  %v814_v22 = vld [vmem:[#allocation7 + $0x28] sm:$0xff]  ;;  %p1016_p1 = scmp.ne.s32.totalorder %s1014_s22, %s1015_s13  ;;  %p1021_p2 = scmp.lt.s32.totalorder %s1019_s24, %s1015_s13 }
  0x37   : > { %v301_v19 = vpack.c.bf16 %v1247_v17, %v1244_v16  ;;  %v816_v20 = vld [vmem:[#allocation7 + $0x38] sm:$0xff]  ;;  %v815_v21 = vld [vmem:[#allocation7 + $0x30] sm:$0xff]  ;;  %v1254_v23 = vld [vmem:[%s1211_s16 + $0x20] sm:$0xff] }
  0x38   : > { %509 = vmatpush.bf16.msra.mxu1 %v816_v20  ;;  %826 = vmatpush.bf16.msra.mxu3 %v816_v20  ;;  %v1257_v24 = vld [vmem:[%s1211_s16 + $0x28] sm:$0xff]  ;;  %v1260_v25 = vld [vmem:[%s1211_s16 + $0x60] sm:$0xff]  ;;  %v1270_v30 = vld [vmem:[%s1211_s16 + $0x30] sm:$0xff]  ;;  %p1017_p4 = pnand %p1016_p1, %p1175_p3  ;;  %p1022_p9 = por %p1021_p2, %p1020_p11 }
  0x39   : > { %v1263_v26 = vld [vmem:[%s1211_s16 + $0x68] sm:$0xff]  ;;  %v813_v27 = vld [vmem:[#allocation7 + $0x20] sm:$0xff]  ;;  %v298_v28 = vpack.c.bf16 %v1257_v24, %v1254_v23  ;;  %v1273_v31 = vld [vmem:[%s1211_s16 + $0x38] sm:$0xff] }
  0x3a   : > { %374 = vmatpush.bf16.msra.mxu0 %v806_v2  ;;  %820 = vmatpush.bf16.msra.mxu2 %v806_v2  ;;  %v302_v29 = vpack.c.bf16 %v1263_v26, %v1260_v25  ;;  %v1276_v32 = vld [vmem:[%s1211_s16 + $0x70] sm:$0xff]  ;;  %v1279_v33 = vld [vmem:[%s1211_s16 + $0x78] sm:$0xff]  ;;  %v299_v34 = vpack.c.bf16 %v1273_v31, %v1270_v30  ;;  %v810_v38 = vld [vmem:[#allocation7 + $0x8] sm:$0xff]  ;;  %p1018_p8 = pneg %p1017_p4 }
  0x3b   : > { %v303_v35 = vpack.c.bf16 %v1279_v33, %v1276_v32  ;;  %v812_v36 = vld [vmem:[#allocation7 + $0x18] sm:$0xff]  ;;  %v811_v37 = vld [vmem:[#allocation7 + $0x10] sm:$0xff]  ;;  %v809_v39 = vld [vmem:[#allocation7] sm:$0xff] }
  0x3c   : > { %510 = vmatpush.bf16.msra.mxu1 %v815_v21  ;;  %827 = vmatpush.bf16.msra.mxu3 %v815_v21  ;;  %v907_v41 = vld [vmem:[%s1381_s2] ss:$0 sm:$0xff]  ;;  %p1023_p10 = pnand %p1022_p9, %p1018_p8 }
  0x3e   : > { %375 = vmatpush.bf16.msra.mxu0 %v805_v3  ;;  %821 = vmatpush.bf16.msra.mxu2 %v805_v3 }
  0x40   : > { %511 = vmatpush.bf16.msra.mxu1 %v814_v22  ;;  %828 = vmatpush.bf16.msra.mxu3 %v814_v22 }
  0x42   : > { %376 = vmatpush.bf16.msra.mxu0 %v804_v4  ;;  %822 = vmatpush.bf16.msra.mxu2 %v804_v4 }
  0x44   : > { %512 = vmatpush.bf16.msra.mxu1 %v813_v27  ;;  %829 = vmatpush.bf16.msra.mxu3 %v813_v27 }
  0x46   : > { %377 = vmatpush.bf16.msra.mxu0 %v803_v5  ;;  %823 = vmatpush.bf16.msra.mxu2 %v803_v5 }
  0x48   : > { %513 = vmatpush.bf16.msra.mxu1 %v812_v36  ;;  %830 = vmatpush.bf16.msra.mxu3 %v812_v36 }
  0x4a   : > { %378 = vmatpush.bf16.msra.mxu0 %v802_v6  ;;  %824 = vmatpush.bf16.msra.mxu2 %v802_v6 }
  0x4c   : > { %514 = vmatpush.bf16.msra.mxu1 %v811_v37  ;;  %831 = vmatpush.bf16.msra.mxu3 %v811_v37 }
  0x4e   : > { %379 = vmatpush.bf16.msra.mxu0 %v801_v7  ;;  %825 = vmatpush.bf16.msra.mxu2 %v801_v7 }
  0x50   : > { %515 = vmatpush.bf16.msra.mxu1 %v810_v38  ;;  %832 = vmatpush.bf16.msra.mxu3 %v810_v38 }
  0x51   : > { %380 = vmatmul.bf16.vlgmr.msra.gmra.mxu0 %v296_v12  ;;  %400 = vmatmul.bf16.vlgmr.msra.gmra.mxu2 %v300_v13 }
  0x54   : > { %516 = vmatpush.bf16.msra.mxu1 %v809_v39  ;;  %833 = vmatpush.bf16.msra.mxu3 %v809_v39 }
  0x61   : > { %385 = vmatmul.bf16.gmra.mxu0 %v297_v18  ;;  %405 = vmatmul.bf16.gmra.mxu2 %v301_v19 }
  0x71   : > { %390 = vmatmul.bf16.gmra.mxu0 %v298_v28  ;;  %410 = vmatmul.bf16.gmra.mxu2 %v302_v29 }
  0x81   : > { %395 = vmatmul.bf16.gmra.mxu0 %v299_v34  ;;  %415 = vmatmul.bf16.gmra.mxu2 %v303_v35 }
  0xce   : > { %v381_v40 = vpop.f32.mrf.mxu0 }
  0xcf   : > { %v382_v42 = vadd.f32 %v907_v41, %v381_v40 }
  0xd1   : > { %v421_v45 = vmax.f32 %v382_v42, 0.0 }
  0xd4   : > { %v401_v43 = vpop.f32.mrf.mxu2 }
  0xd5   : > { %v402_v48 = vadd.f32 %v907_v41, %v401_v43 }
  0xd6   : > { %v383_v44 = vpop.f32.mrf.mxu0 }
  0xd7   : > { %v384_v46 = vadd.f32 %v907_v41, %v383_v44  ;;  %v429_v53 = vmax.f32 %v402_v48, 0.0 }
  0xd9   : > { %v422_v47 = vmax.f32 %v384_v46, 0.0 }
  0xdb   : > { %v437_v49 = vpack.c.bf16 %v422_v47, %v421_v45 }
  0xdc   : > { %v403_v50 = vpop.f32.mrf.mxu2 }
  0xdd   : > { %v404_v51 = vadd.f32 %v907_v41, %v403_v50  ;;  %517 = vmatmul.bf16.vlgmr.msra.gmra.mxu1 %v437_v49  ;;  %v1291_v50 = vld [vmem:[%s1383_s4] ss:$0 sm:$0xff] }
  0xde   : > { %v386_v52 = vpop.f32.mrf.mxu0 }
  0xdf   : > { %v430_v54 = vmax.f32 %v404_v51, 0.0  ;;  %v387_v56 = vadd.f32 %v907_v41, %v386_v52 }
  0xe1   : > { %v441_v55 = vpack.c.bf16 %v430_v54, %v429_v53  ;;  %v423_v59 = vmax.f32 %v387_v56, 0.0 }
  0xe3   : > { %537 = vmatmul.bf16.vlgmr.msra.gmra.mxu3 %v441_v55 }
  0xe4   : > { %v406_v57 = vpop.f32.mrf.mxu2 }
  0xe5   : > { %v407_v62 = vadd.f32 %v907_v41, %v406_v57 }
  0xe6   : > { %v388_v58 = vpop.f32.mrf.mxu0 }
  0xe7   : > { %v389_v60 = vadd.f32 %v907_v41, %v388_v58  ;;  %v431_v3 = vmax.f32 %v407_v62, 0.0 }
  0xe9   : > { %v424_v61 = vmax.f32 %v389_v60, 0.0 }
  0xeb   : > { %v438_v63 = vpack.c.bf16 %v424_v61, %v423_v59 }
  0xec   : > { %v408_v0 = vpop.f32.mrf.mxu2 }
  0xed   : > { %v409_v1 = vadd.f32 %v907_v41, %v408_v0  ;;  %522 = vmatmul.bf16.gmra.mxu1 %v438_v63 }
  0xee   : > { %v391_v2 = vpop.f32.mrf.mxu0 }
  0xef   : > { %v432_v4 = vmax.f32 %v409_v1, 0.0  ;;  %v392_v6 = vadd.f32 %v907_v41, %v391_v2 }
  0xf1   : > { %v442_v5 = vpack.c.bf16 %v432_v4, %v431_v3  ;;  %v425_v13 = vmax.f32 %v392_v6, 0.0 }
  0xf3   : > { %542 = vmatmul.bf16.gmra.mxu3 %v442_v5 }
  0xf4   : > { %v411_v7 = vpop.f32.mrf.mxu2 }
  0xf5   : > { %v412_v20 = vadd.f32 %v907_v41, %v411_v7 }
  0xf6   : > { %v393_v12 = vpop.f32.mrf.mxu0 }
  0xf7   : > { %v394_v18 = vadd.f32 %v907_v41, %v393_v12  ;;  %v433_v29 = vmax.f32 %v412_v20, 0.0 }
  0xf9   : > { %v426_v19 = vmax.f32 %v394_v18, 0.0 }
  0xfb   : > { %v439_v21 = vpack.c.bf16 %v426_v19, %v425_v13 }
  0xfc   : > { %v413_v22 = vpop.f32.mrf.mxu2 }
  0xfd   : > { %v414_v27 = vadd.f32 %v907_v41, %v413_v22  ;;  %527 = vmatmul.bf16.gmra.mxu1 %v439_v21 }
  0xfe   : > { %v396_v28 = vpop.f32.mrf.mxu0 }
  0xff   : > { %v434_v34 = vmax.f32 %v414_v27, 0.0  ;;  %v397_v36 = vadd.f32 %v907_v41, %v396_v28 }
 0x101   : > { %v443_v35 = vpack.c.bf16 %v434_v34, %v433_v29  ;;  %v427_v39 = vmax.f32 %v397_v36, 0.0 }
 0x103   : > { %547 = vmatmul.bf16.gmra.mxu3 %v443_v35 }
 0x104   : > { %v416_v37 = vpop.f32.mrf.mxu2 }
 0x105   : > { %v417_v43 = vadd.f32 %v907_v41, %v416_v37 }
 0x106   : > { %v398_v38 = vpop.f32.mrf.mxu0 }
 0x107   : > { %v399_v40 = vadd.f32 %v907_v41, %v398_v38  ;;  %v435_v47 = vmax.f32 %v417_v43, 0.0 }
 0x109   : > { %v428_v42 = vmax.f32 %v399_v40, 0.0 }
 0x10b   : > { %v440_v44 = vpack.c.bf16 %v428_v42, %v427_v39 }
 0x10c   : > { %v418_v45 = vpop.f32.mrf.mxu2 }
 0x10d   : > { %v419_v46 = vadd.f32 %v907_v41, %v418_v45  ;;  %532 = vmatmul.bf16.gmra.mxu1 %v440_v44 }
 0x10f   : > { %v436_v48 = vmax.f32 %v419_v46, 0.0 }
 0x111   : > { %v444_v49 = vpack.c.bf16 %v436_v48, %v435_v47 }
 0x113   : > { %552 = vmatmul.bf16.gmra.mxu3 %v444_v49 }
 0x15a   : > { %v518_v51 = vpop.f32.mrf.mxu1 }
 0x15b   : > { %v558_v52 = vadd.f32 %v518_v51, %v1222_v8 }
 0x15d   : > { %v578_v53 = vadd.f32 %v1291_v50, %v558_v52 }
 0x15f   : > { %594 = vst [vmem:[%s1297_s11] sm:$0xff] %v578_v53 }
 0x162   : > { %v520_v41 = vpop.f32.mrf.mxu1 }
 0x163   : > { %v559_v54 = vadd.f32 %v520_v41, %v1225_v9 }
 0x165   : > { %v579_v55 = vadd.f32 %v1291_v50, %v559_v54 }
 0x166   : > { %v538_v56 = vpop.f32.mrf.mxu3 }
 0x167   : > { %595 = vst [vmem:[%s1297_s11 + $0x8] sm:$0xff] %v579_v55  ;;  %v566_v8 = vadd.f32 %v538_v56, %v1228_v10 }
 0x169   : > { %v586_v57 = vadd.f32 %v1291_v50, %v566_v8 }
 0x16a   : > { %v523_v58 = vpop.f32.mrf.mxu1 }
 0x16b   : > { %602 = vst [vmem:[%s1297_s11 + $0x40] sm:$0xff] %v586_v57  ;;  %v560_v59 = vadd.f32 %v523_v58, %v1238_v14 }
 0x16d   : > { %v580_v60 = vadd.f32 %v1291_v50, %v560_v59 }
 0x16e   : > { %v540_v61 = vpop.f32.mrf.mxu3 }
 0x16f   : > { %596 = vst [vmem:[%s1297_s11 + $0x10] sm:$0xff] %v580_v60  ;;  %v567_v9 = vadd.f32 %v540_v61, %v1231_v11 }
 0x171   : > { %v587_v62 = vadd.f32 %v1291_v50, %v567_v9 }
 0x172   : > { %v525_v63 = vpop.f32.mrf.mxu1 }
 0x173   : > { %603 = vst [vmem:[%s1297_s11 + $0x48] sm:$0xff] %v587_v62  ;;  %v561_v10 = vadd.f32 %v525_v63, %v1241_v15 }
 0x175   : > { %v581_v0 = vadd.f32 %v1291_v50, %v561_v10 }
 0x176   : > { %v543_v1 = vpop.f32.mrf.mxu3 }
 0x177   : > { %597 = vst [vmem:[%s1297_s11 + $0x18] sm:$0xff] %v581_v0  ;;  %v568_v14 = vadd.f32 %v543_v1, %v1244_v16 }
 0x179   : > { %v588_v2 = vadd.f32 %v1291_v50, %v568_v14 }
 0x17a   : > { %v528_v3 = vpop.f32.mrf.mxu1 }
 0x17b   : > { %604 = vst [vmem:[%s1297_s11 + $0x50] sm:$0xff] %v588_v2  ;;  %v562_v11 = vadd.f32 %v528_v3, %v1254_v23 }
 0x17d   : > { %v582_v4 = vadd.f32 %v1291_v50, %v562_v11 }
 0x17e   : > { %v545_v5 = vpop.f32.mrf.mxu3 }
 0x17f   : > { %598 = vst [vmem:[%s1297_s11 + $0x20] sm:$0xff] %v582_v4  ;;  %v569_v15 = vadd.f32 %v545_v5, %v1247_v17 }
 0x181   : > { %v589_v6 = vadd.f32 %v1291_v50, %v569_v15 }
 0x182   : > { %v530_v7 = vpop.f32.mrf.mxu1 }
 0x183   : > { %605 = vst [vmem:[%s1297_s11 + $0x58] sm:$0xff] %v589_v6  ;;  %v563_v16 = vadd.f32 %v530_v7, %v1257_v24 }
 0x185   : > { %v583_v12 = vadd.f32 %v1291_v50, %v563_v16 }
 0x186   : > { %v548_v13 = vpop.f32.mrf.mxu3 }
 0x187   : > { %599 = vst [vmem:[%s1297_s11 + $0x28] sm:$0xff] %v583_v12  ;;  %v570_v23 = vadd.f32 %v548_v13, %v1260_v25 }
 0x189   : > { %v590_v18 = vadd.f32 %v1291_v50, %v570_v23 }
 0x18a   : > { %v533_v19 = vpop.f32.mrf.mxu1 }
 0x18b   : > { %606 = vst [vmem:[%s1297_s11 + $0x60] sm:$0xff] %v590_v18  ;;  %v564_v17 = vadd.f32 %v533_v19, %v1270_v30 }
 0x18d   : > { %v584_v20 = vadd.f32 %v1291_v50, %v564_v17 }
 0x18e   : > { %v550_v21 = vpop.f32.mrf.mxu3 }
 0x18f   : > { %600 = vst [vmem:[%s1297_s11 + $0x30] sm:$0xff] %v584_v20  ;;  %v571_v24 = vadd.f32 %v550_v21, %v1263_v26 }
 0x191   : > { %v591_v22 = vadd.f32 %v1291_v50, %v571_v24 }
 0x192   : > { %v535_v27 = vpop.f32.mrf.mxu1 }
 0x193   : > { %607 = vst [vmem:[%s1297_s11 + $0x68] sm:$0xff] %v591_v22  ;;  %v565_v25 = vadd.f32 %v535_v27, %v1273_v31 }
 0x195   : > { %v585_v28 = vadd.f32 %v1291_v50, %v565_v25 }
 0x196   : > { %v553_v29 = vpop.f32.mrf.mxu3 }
 0x197   : > { %601 = vst [vmem:[%s1297_s11 + $0x38] sm:$0xff] %v585_v28  ;;  %v572_v30 = vadd.f32 %v553_v29, %v1276_v32 }
 0x199   : > { %v592_v34 = vadd.f32 %v1291_v50, %v572_v30 }
 0x19b   : > { %608 = vst [vmem:[%s1297_s11 + $0x70] sm:$0xff] %v592_v34 }
 0x19e   : > { %v555_v26 = vpop.f32.mrf.mxu3 }
 0x19f   : > { %v573_v31 = vadd.f32 %v555_v26, %v1279_v33 }
 0x1a1   : > { %v593_v35 = vadd.f32 %v1291_v50, %v573_v31 }
 0x1a3   : > { %609 = vst [vmem:[%s1297_s11 + $0x78] sm:$0xff] %v593_v35 }
 0x1a4   : > { %1026 = shalt.err (!%p1023_p10)
}
 0x1a5   : > { %s1077_s8 = smov 128   ;;  %s1078_s10 = smov 8  }
 0x1a6   : > { %844 = dma.vmem_to_hbm [thread:$0]  (%p1175_p3), %s624_s6, 2048, %s626_s26, %s611_s7, %s1077_s8, %s1077_s8, %s1078_s10  }
 0x1a7 PF: > { %s640_s11 = sand.u32 1, %s1057_s18   ;;  %p1390_p12 = scmp.ge.s32.totalorder %s1069_s21, 2 }
 0x1a8   : > { %s641_s12 = scalar_lea.sflag [#allocation4], %s640_s11 }
 0x1a9   : > { %p858_p13 = pnand %p1390_p12, %p1144_p6 }
 0x1ab   : > { %p859_p0 = pneg %p858_p13 }
 0x1ad   : > { %1052 = dma.done.wait (%p859_p0), %s641_s12, 2048  }
 0x1ae   : > { %1054 = vsyncadd (%p859_p0), %s641_s12, 4294965248  ;;  %p19_p5 = scmp.ge.s32.totalorder %s1165_s14, 4   ;;  %s1391_s18 = smov %s1061_s19 }
 0x1af   : > { %s1392_s19 = smov %s1065_s20  ;;  %s1393_s20 = smov %s1181_s23 }
 0x1b0   : > { %s1394_s21 = smov %s1165_s14  ;;  %21 = sbr.rel (!%p19_p5) target bundleno = 6 (0x6), region = 93 }
 0x1b5   :  { %647 = vsyncpa [#allocation3], 1 }
 0x1b6   :  { %649 = vsyncpa [#allocation3 + $0x1], 1 }
 0x1b7   :  { %650 = vsyncpa [#allocation6], 1 }
 0x1b8   :  { %651 = vsyncpa [#allocation4], 1 }
 0x1b9   :  { %653 = vsyncpa [#allocation4 + $0x1], 1 }

</bundles_post_ra>
